<compile_context>
chip_gen: v5e
topology: v5e:2x2
jax: 0.10.0
libtpu: 0.0.40
codegen_flags: <defaults>
</compile_context>

<pallas_src>
import functools
import math

import jax
import jax.numpy as jnp
from jax.experimental import pallas as pl
from jax.experimental.pallas import tpu as pltpu

_LANES = 128


def _channel_attention_kernel(x_ref, w1_ref, w2t_ref, o_ref, max_sc, sum_sc,
                              *, S, ts):
    s = pl.program_id(1)
    last = pl.num_programs(1) - 1

    @pl.when(s == 0)
    def _init():
        max_sc[...] = jnp.full_like(max_sc, -jnp.inf)
        sum_sc[...] = jnp.zeros_like(sum_sc)

    x = x_ref[0]                                           # (C, ts), activation dtype

    def _accumulate(x_for_max, x_for_sum_f32):
        # Max in the native dtype (exact; cast after the reduce), sum in f32.
        max_sc[...] = jnp.maximum(
            max_sc[...],
            jnp.max(x_for_max, axis=-1, keepdims=True).astype(jnp.float32))
        sum_sc[...] = sum_sc[...] + jnp.sum(x_for_sum_f32, axis=-1, keepdims=True)

    rem = S % ts                                           # static at trace time
    if rem == 0:
        # All tiles are full: no masking anywhere.
        _accumulate(x, x.astype(jnp.float32))
    else:
        @pl.when(s != last)
        def _interior():
            _accumulate(x, x.astype(jnp.float32))

        @pl.when(s == last)
        def _tail():
            # Only the partial last tile pays the iota/compare/select cost.
            lane = jax.lax.broadcasted_iota(jnp.int32, x.shape, dimension=1)
            valid = lane < rem
            x_mx = jnp.where(valid, x, jnp.asarray(-jnp.inf, dtype=x.dtype))
            x_sm = jnp.where(valid, x.astype(jnp.float32), 0.0)
            _accumulate(x_mx, x_sm)

    @pl.when(s == last)
    def _finalize():
        mx = max_sc[...]                                   # (C, 1)  global max pool
        avg = sum_sc[...] * (1.0 / S)                      # (C, 1)  global avg pool
        pooled = jnp.concatenate([mx, avg], axis=1)        # (C, 2)
        w1 = w1_ref[...].astype(jnp.float32)               # (Cr, C)
        w2t = w2t_ref[...].astype(jnp.float32)             # (Cr, C)  (= w2.T)
        # se(max) + se(avg) with 2 projections instead of 4 (exact: 2nd conv is linear).
        h = jnp.maximum(
            jnp.dot(w1, pooled, preferred_element_type=jnp.float32), 0.0)  # (Cr, 2)
        hsum = h[:, 0:1] + h[:, 1:2]                       # (Cr, 1)
        # logits[c] = sum_k w2[c, k] * hsum[k]  ->  lane-dense (1, C) row.
        logits = jnp.sum(hsum * w2t, axis=0, keepdims=True)               # (1, C)
        o_ref[0] = jax.nn.sigmoid(logits).astype(o_ref.dtype)


def _pick_spatial_tile(S, C, itemsize, x_budget_bytes, max_spatial_tile=None):
    """Largest lane-aligned spatial tile whose double-buffered x block fits the budget."""
    max_ts = (x_budget_bytes // (2 * C * itemsize)) // _LANES * _LANES
    max_ts = max(max_ts, _LANES)
    if max_spatial_tile is not None:
        max_ts = min(max_ts, max(_LANES, (max_spatial_tile // _LANES) * _LANES))
    return S if S <= max_ts else max_ts


def channel_attention(x_nchw, w1, w2, *,
                      x_vmem_budget_bytes=8 * 1024 * 1024,
                      max_spatial_tile=None):
    """ChannelAttention forward.

    x_nchw: (N, C, H, W)
    w1: (C//r, C)   -- Conv2d(C, C//r, 1, bias=False).weight squeezed
    w2: (C, C//r)   -- Conv2d(C//r, C, 1, bias=False).weight squeezed
    Returns the attention map, shape (N, C, 1, 1).
    """
    N, C, H, W = x_nchw.shape
    Cr = w1.shape[0]
    S = H * W
    x3 = x_nchw.reshape(N, C, S)
    # Layout plumbing (one-time, outside the kernel): transposed w2 lets the
    # epilogue emit a lane-dense (1, C) output row.
    w2t = jnp.transpose(w2)                                # (Cr, C)

    itemsize = jnp.dtype(x3.dtype).itemsize
    ts = _pick_spatial_tile(S, C, itemsize, x_vmem_budget_bytes, max_spatial_tile)
    n_s = pl.cdiv(S, ts)

    kernel = functools.partial(_channel_attention_kernel, S=S, ts=ts)

    # Pooling (~2 ops/elem over both paths) + 2-matmul SE epilogue per batch element.
    flops = N * (2 * C * S + 4 * Cr * C + 2 * Cr * C)
    bytes_accessed = (x3.size * itemsize
                      + w1.size * jnp.dtype(w1.dtype).itemsize
                      + w2t.size * jnp.dtype(w2t.dtype).itemsize
                      + N * C * 4)
    cost = pl.CostEstimate(flops=flops, transcendentals=N * C,
                           bytes_accessed=bytes_accessed)

    # Explicit scoped-VMEM budget: double-buffered x tile + resident weights +
    # lane-padded scratch + output block, with slack; clamped to [16, 32] MiB so
    # it is comfortable on v5e/v6e/v7x alike.
    est_vmem = (2 * C * ts * itemsize
                + 2 * (w1.size * jnp.dtype(w1.dtype).itemsize
                       + w2t.size * jnp.dtype(w2t.dtype).itemsize)
                + 2 * C * _LANES * 4
                + 2 * 8 * max(C, _LANES) * 4)
    vmem_limit = int(min(32 * 1024 * 1024,
                         max(16 * 1024 * 1024, round(est_vmem * 1.5))))

    out = pl.pallas_call(
        kernel,
        out_shape=jax.ShapeDtypeStruct((N, 1, C), jnp.float32),
        grid=(N, n_s),
        in_specs=[
            pl.BlockSpec((1, C, ts), lambda n, s: (n, 0, s)),   # x tile (streamed)
            pl.BlockSpec((Cr, C), lambda n, s: (0, 0)),         # w1   (resident)
            pl.BlockSpec((Cr, C), lambda n, s: (0, 0)),         # w2.T (resident)
        ],
        out_specs=pl.BlockSpec((1, 1, C), lambda n, s: (n, 0, 0)),
        scratch_shapes=[pltpu.VMEM((C, 1), jnp.float32),        # running max
                        pltpu.VMEM((C, 1), jnp.float32)],       # running sum
        compiler_params=pltpu.CompilerParams(
            dimension_semantics=("parallel", "arbitrary"),
            vmem_limit_bytes=vmem_limit),
        cost_estimate=cost,
    )(x3, w1, w2t)
    return out.reshape(N, C, 1, 1)


def channel_attention_ref(x, w1, w2):
    """Pure-JAX reference matching the PyTorch module."""
    mx = jnp.max(x, axis=(2, 3))                           # (N, C)
    avg = jnp.mean(x, axis=(2, 3))                         # (N, C)

    def se(v):
        h = jnp.maximum(v @ w1.T, 0.0)                     # (N, Cr)
        return h @ w2.T                                    # (N, C)

    out = jax.nn.sigmoid(se(mx) + se(avg))
    return out[:, :, None, None]


if __name__ == "__main__":
    key = jax.random.PRNGKey(0)
    kx, k1, k2, kx2 = jax.random.split(key, 4)

    # channel must be a multiple of reduction (=16 default) -> C=128, Cr=8
    N, C, H, W = 2, 128, 16, 16
    reduction = 16
    Cr = C // reduction

    x = jax.random.normal(kx, (N, C, H, W), jnp.float32)
    # PyTorch Conv2d(C, Cr, 1, bias=False).weight -> (Cr, C, 1, 1) squeezed to (Cr, C)
    w1 = jax.random.normal(k1, (Cr, C), jnp.float32) / math.sqrt(C)
    # PyTorch Conv2d(Cr, C, 1, bias=False).weight -> (C, Cr, 1, 1) squeezed to (C, Cr)
    w2 = jax.random.normal(k2, (C, Cr), jnp.float32) / math.sqrt(Cr)

    # Single-tile fast path (S fits in one lane-aligned block, no masking).
    out = channel_attention(x, w1, w2)
    jax.block_until_ready(out)
    ref = channel_attention_ref(x, w1, w2)
    assert out.shape == (N, C, 1, 1), out.shape
    assert bool(jnp.all(jnp.isfinite(out)))
    assert bool(jnp.allclose(out, ref, rtol=1e-4, atol=1e-5)), \
        float(jnp.max(jnp.abs(out - ref)))

    # Multi-tile path with a masked partial last tile (S=272, ts=128 -> 3 tiles, rem=16).
    x2 = jax.random.normal(kx2, (1, C, 17, 16), jnp.float32)
    out2 = channel_attention(x2, w1, w2, max_spatial_tile=128)
    jax.block_until_ready(out2)
    ref2 = channel_attention_ref(x2, w1, w2)
    assert bool(jnp.allclose(out2, ref2, rtol=1e-4, atol=1e-5)), \
        float(jnp.max(jnp.abs(out2 - ref2)))

    print("KERNEL_OK")
</pallas_src>

<mosaic_0001>
module attributes {stable_mosaic.version = 11 : i64} {
  func.func @_channel_attention_kernel(%arg0: i32, %arg1: i32, %arg2: memref<1x128x256xf32, #tpu.memory_space<vmem>>, %arg3: memref<8x128xf32, #tpu.memory_space<vmem>>, %arg4: memref<8x128xf32, #tpu.memory_space<vmem>>, %arg5: memref<1x1x128xf32, #tpu.memory_space<vmem>>, %arg6: memref<128x1xf32, #tpu.memory_space<vmem>>, %arg7: memref<128x1xf32, #tpu.memory_space<vmem>>) attributes {dimension_semantics = [#tpu.dimension_semantics<parallel>, #tpu.dimension_semantics<arbitrary>], iteration_bounds = array<i64: 2, 1>, scalar_prefetch = 0 : i64, scratch_operands = 2 : i64, tpu.core_type = #tpu.core_type<tc>, window_params = [{transform_indices = @transform_0, window_bounds = array<i64: 1, 128, 256>}, {pipeline_mode = #tpu.pipeline_mode<synchronous>, transform_indices = @transform_1, window_bounds = array<i64: 8, 128>}, {pipeline_mode = #tpu.pipeline_mode<synchronous>, transform_indices = @transform_2, window_bounds = array<i64: 8, 128>}, {transform_indices = @transform_3, window_bounds = array<i64: 1, 1, 128>}]} {
    %c0_i32 = arith.constant 0 : i32
    %0 = arith.cmpi eq, %arg1, %c0_i32 : i32
    %1 = arith.extui %0 : i1 to i32
    %c0_i32_0 = arith.constant 0 : i32
    %2 = arith.cmpi ne, %1, %c0_i32_0 : i32
    scf.if %2 {
      %cst_14 = arith.constant 0xFF800000 : f32
      %18 = vector.broadcast %cst_14 : f32 to vector<128x1xf32>
      %c0_15 = arith.constant 0 : index
      %c0_16 = arith.constant 0 : index
      %19 = vector.load %arg6[%c0_15, %c0_16] : memref<128x1xf32, #tpu.memory_space<vmem>>, vector<128x1xf32>
      tpu.vector_store %arg6[%c0_15, %c0_16], %18 {strides = array<i32>} : memref<128x1xf32, #tpu.memory_space<vmem>>, vector<128x1xf32>,
      %cst_17 = arith.constant 0.000000e+00 : f32
      %20 = vector.broadcast %cst_17 : f32 to vector<128x1xf32>
      %c0_18 = arith.constant 0 : index
      %c0_19 = arith.constant 0 : index
      %21 = vector.load %arg7[%c0_18, %c0_19] : memref<128x1xf32, #tpu.memory_space<vmem>>, vector<128x1xf32>
      tpu.vector_store %arg7[%c0_18, %c0_19], %20 {strides = array<i32>} : memref<128x1xf32, #tpu.memory_space<vmem>>, vector<128x1xf32>,
    } else {
    }
    %c0 = arith.constant 0 : index
    %c0_1 = arith.constant 0 : index
    %c0_2 = arith.constant 0 : index
    %3 = vector.load %arg2[%c0, %c0_1, %c0_2] : memref<1x128x256xf32, #tpu.memory_space<vmem>>, vector<1x128x256xf32>
    %4 = vector.shape_cast %3 : vector<1x128x256xf32> to vector<128x256xf32>
    %c0_3 = arith.constant 0 : index
    %c0_4 = arith.constant 0 : index
    %5 = vector.load %arg6[%c0_3, %c0_4] : memref<128x1xf32, #tpu.memory_space<vmem>>, vector<128x1xf32>
    %cst = arith.constant dense<0xFF800000> : vector<128xf32>
    %6 = vector.multi_reduction <maximumf>, %4, %cst [1] : vector<128x256xf32> to vector<128xf32>
    %7 = vector.shape_cast %6 : vector<128xf32> to vector<128x1xf32>
    %8 = arith.maximumf %5, %7 : vector<128x1xf32>
    %c0_5 = arith.constant 0 : index
    %c0_6 = arith.constant 0 : index
    %9 = vector.load %arg6[%c0_5, %c0_6] : memref<128x1xf32, #tpu.memory_space<vmem>>, vector<128x1xf32>
    tpu.vector_store %arg6[%c0_5, %c0_6], %8 {strides = array<i32>} : memref<128x1xf32, #tpu.memory_space<vmem>>, vector<128x1xf32>,
    %c0_7 = arith.constant 0 : index
    %c0_8 = arith.constant 0 : index
    %10 = vector.load %arg7[%c0_7, %c0_8] : memref<128x1xf32, #tpu.memory_space<vmem>>, vector<128x1xf32>
    %cst_9 = arith.constant dense<0.000000e+00> : vector<128xf32>
    %11 = vector.multi_reduction <add>, %4, %cst_9 [1] : vector<128x256xf32> to vector<128xf32>
    %12 = vector.shape_cast %11 : vector<128xf32> to vector<128x1xf32>
    %13 = arith.addf %10, %12 : vector<128x1xf32>
    %c0_10 = arith.constant 0 : index
    %c0_11 = arith.constant 0 : index
    %14 = vector.load %arg7[%c0_10, %c0_11] : memref<128x1xf32, #tpu.memory_space<vmem>>, vector<128x1xf32>
    tpu.vector_store %arg7[%c0_10, %c0_11], %13 {strides = array<i32>} : memref<128x1xf32, #tpu.memory_space<vmem>>, vector<128x1xf32>,
    %c0_i32_12 = arith.constant 0 : i32
    %15 = arith.cmpi eq, %arg1, %c0_i32_12 : i32
    %16 = arith.extui %15 : i1 to i32
    %c0_i32_13 = arith.constant 0 : i32
    %17 = arith.cmpi ne, %16, %c0_i32_13 : i32
    scf.if %17 {
      %c0_14 = arith.constant 0 : index
      %c0_15 = arith.constant 0 : index
      %18 = vector.load %arg6[%c0_14, %c0_15] : memref<128x1xf32, #tpu.memory_space<vmem>>, vector<128x1xf32>
      %c0_16 = arith.constant 0 : index
      %c0_17 = arith.constant 0 : index
      %19 = vector.load %arg7[%c0_16, %c0_17] : memref<128x1xf32, #tpu.memory_space<vmem>>, vector<128x1xf32>
      %cst_18 = arith.constant 3.906250e-03 : f32
      %20 = vector.broadcast %cst_18 : f32 to vector<128x1xf32>
      %21 = arith.mulf %19, %20 : vector<128x1xf32>
      %22 = tpu.concatenate %18, %21 in 1 : vector<128x1xf32>, vector<128x1xf32> -> vector<128x2xf32>
      %c0_19 = arith.constant 0 : index
      %c0_20 = arith.constant 0 : index
      %23 = vector.load %arg3[%c0_19, %c0_20] : memref<8x128xf32, #tpu.memory_space<vmem>>, vector<8x128xf32>
      %c0_21 = arith.constant 0 : index
      %c0_22 = arith.constant 0 : index
      %24 = vector.load %arg4[%c0_21, %c0_22] : memref<8x128xf32, #tpu.memory_space<vmem>>, vector<8x128xf32>
      %cst_23 = arith.constant dense<0.000000e+00> : vector<8x2xf32>
      %25 = tpu.matmul %23, %22, %cst_23 {dimension_numbers = #tpu.dot_dimension_numbers<[1], [0], [0], [1], [0, 0, 1, 1], [], []>} : vector<8x128xf32>, vector<128x2xf32>, vector<8x2xf32> -> vector<8x2xf32>
      %cst_24 = arith.constant 0.000000e+00 : f32
      %26 = vector.broadcast %cst_24 : f32 to vector<8x2xf32>
      %27 = arith.maximumf %25, %26 : vector<8x2xf32>
      %28 = vector.extract_strided_slice %27 {offsets = [0, 0], sizes = [8, 1], strides = [1, 1]} : vector<8x2xf32> to vector<8x1xf32>
      %29 = vector.extract_strided_slice %27 {offsets = [0, 1], sizes = [8, 1], strides = [1, 1]} : vector<8x2xf32> to vector<8x1xf32>
      %30 = arith.addf %28, %29 : vector<8x1xf32>
      %31 = vector.broadcast %30 : vector<8x1xf32> to vector<8x128xf32>
      %32 = arith.mulf %31, %24 : vector<8x128xf32>
      %cst_25 = arith.constant dense<0.000000e+00> : vector<128xf32>
      %33 = vector.multi_reduction <add>, %32, %cst_25 [0] : vector<8x128xf32> to vector<128xf32>
      %34 = vector.shape_cast %33 : vector<128xf32> to vector<1x128xf32>
      %35 = arith.negf %34 : vector<1x128xf32>
      %36 = math.exp %35 : vector<1x128xf32>
      %cst_26 = arith.constant 1.000000e+00 : f32
      %37 = vector.broadcast %cst_26 : f32 to vector<1x128xf32>
      %38 = arith.addf %37, %36 : vector<1x128xf32>
      %39 = arith.divf %37, %38 : vector<1x128xf32>
      %c0_27 = arith.constant 0 : index
      %c0_28 = arith.constant 0 : index
      %c0_29 = arith.constant 0 : index
      %40 = vector.load %arg5[%c0_27, %c0_28, %c0_29] : memref<1x1x128xf32, #tpu.memory_space<vmem>>, vector<1x1x128xf32>
      %41 = vector.shape_cast %40 : vector<1x1x128xf32> to vector<1x128xf32>
      %42 = vector.shape_cast %39 : vector<1x128xf32> to vector<1x1x128xf32>
      tpu.vector_store %arg5[%c0_27, %c0_28, %c0_29], %42 {strides = array<i32>} : memref<1x1x128xf32, #tpu.memory_space<vmem>>, vector<1x1x128xf32>,
    } else {
    }
    return
  }
  func.func @transform_0(%arg0: i32, %arg1: i32) -> (i32, i32, i32) {
    %c0_i32 = arith.constant 0 : i32
    %c0_i32_0 = arith.constant 0 : i32
    return %arg0, %c0_i32, %arg1 : i32, i32, i32
  }
  func.func @transform_1(%arg0: i32, %arg1: i32) -> (i32, i32) {
    %c0_i32 = arith.constant 0 : i32
    %c0_i32_0 = arith.constant 0 : i32
    %c0_i32_1 = arith.constant 0 : i32
    return %c0_i32, %c0_i32_0 : i32, i32
  }
  func.func @transform_2(%arg0: i32, %arg1: i32) -> (i32, i32) {
    %c0_i32 = arith.constant 0 : i32
    %c0_i32_0 = arith.constant 0 : i32
    %c0_i32_1 = arith.constant 0 : i32
    return %c0_i32, %c0_i32_0 : i32, i32
  }
  func.func @transform_3(%arg0: i32, %arg1: i32) -> (i32, i32, i32) {
    %c0_i32 = arith.constant 0 : i32
    %c0_i32_0 = arith.constant 0 : i32
    %c0_i32_1 = arith.constant 0 : i32
    return %arg0, %c0_i32, %c0_i32_0 : i32, i32, i32
  }
}

</mosaic_0001>

<bundles_post_ra>
// kernel: tpu_custom_call.1
= control target key start
LH: loop header
LB: loop body
LE: loop exit
PB: predicated region body
PF: predicated region fallthrough
CT: control target
= control target key end

     0   :  { %s1538_s0 = inlined_call_operand.hbm [shape: f32[2,128,256], index: 0, kind: input, shape index: {}]   ;;  %s1539_s1 = inlined_call_operand.hbm [shape: f32[8,128], index: 1, kind: input, shape index: {}]   ;;  %s1540_s2 = inlined_call_operand.hbm [shape: f32[8,128], index: 2, kind: input, shape index: {}]   ;;  %s1541_s3 = inlined_call_operand.hbm [shape: f32[2,1,128], index: 3, kind: output, shape index: {}]  }
   0x1   :  { %1542 = sst [smem:[#allocation14_spill]] %s1539_s1 }
   0x2   :  { %8 = vsyncpa [#allocation5], 0 }
   0x3   :  { %10 = vsyncpa [#allocation5 + $0x1], 0 }
   0x4   :  { %11 = vsyncpa [#allocation8], 0 }
   0x5   :  { %12 = vsyncpa [#allocation6], 0 }
   0x6   :  { %14 = vsyncpa [#allocation6 + $0x1], 0  ;;  %s1157_s12 = smov 0   ;;  %s1159_s13 = smov 0  }
   0x7   :  { %s1161_s14 = smov 0   ;;  %s1163_s15 = smov 0  }
   0x8   :  { %s1165_s16 = smov 0   ;;  %s1167_s17 = smov 0  }
   0x9 LB: > { %s798_s18 = sadd.s32 4294967295, %s1126_s17   ;;  %s799_s19 = sadd.s32 4294967294, %s1126_s17   ;;  %s1126_s17 = sphi %s1167_s17, %s20_s17   ;;  %s1122_s16 = sphi %s1165_s16, %s1555_s16   ;;  %s1118_s15 = sphi %s1163_s15, %s1554_s15   ;;  %s1114_s14 = sphi %s1161_s14, %s1553_s14   ;;  %s1110_s13 = sphi %s1159_s13, %s1552_s13   ;;  %s1106_s12 = sphi %s1157_s12, %s1551_s12  }
   0xa   : > { %s41_s20 = sadd.s32 1, %s1114_s14  ;;  %p48_p0 = scmp.ne.s32.totalorder %s1114_s14, %s1110_s13 }
   0xb   : > { %p49_p1 = scmp.eq.s32.totalorder %s1126_s17, 0  ;;  %p54_p2 = scmp.ne.s32.totalorder %s1110_s13, %s1106_s12 }
   0xc   : > { %p1195_p3 = scmp.eq.s32.totalorder %s798_s18, 0  ;;  %p120_p4 = scmp.eq.s32.totalorder %s798_s18, 1 }
   0xd   : > { %p1199_p5 = por %p49_p1, %p48_p0  ;;  %p126_p6 = scmp.eq.s32.totalorder %s799_s19, 1 }
   0xe   : > { %p1205_p7 = por %p1195_p3, %p54_p2  ;;  %p1209_p8 = por %p120_p4, %p48_p0 }
   0xf   : > { %p1213_p9 = por %p126_p6, %p54_p2  ;;  %p800_p10 = scmp.ge.s32.totalorder %s1126_s17, 1 }
  0x10   : > { %p133_p11 = scmp.lt.s32.totalorder %s1126_s17, 3  ;;  %s1548_s1 = sld [smem:[#allocation14_spill]] }
  0x11   : > { %s1128_s30 = smov [#allocation7]   ;;  %p803_p13 = scmp.ge.s32.totalorder %s1126_s17, 2 }
  0x12   : > { %p1222_p12 = pnand %p800_p10, %p133_p11  ;;  %s147_s4 = sshll.u32 %s1128_s30, 4  ;;  %s148_s4 = int_to_ptr.vmem [resolvable:$true] %s147_s4 }
  0x13   : > { %p844_p1 = scmp.lt.s32.totalorder %s1126_s17, 2  ;;  %s157_s7 = sshll.u32 %s1540_s2, 4  ;;  %s158_s7 = int_to_ptr.hbm [resolvable:$true] %s157_s7 }
  0x14   : > { %p827_p0 = pneg %p1222_p12  ;;  %s1129_s9 = smov [#allocation9]  }
  0x15   : > { %p1237_p4 = pnand %p844_p1, %p1199_p5  ;;  %s159_s10 = sshll.u32 %s1129_s9, 4  ;;  %s160_s10 = int_to_ptr.vmem [resolvable:$true] %s159_s10 }
  0x16   : > { %s145_s28 = sshll.u32 %s1548_s1, 4  ;;  %p828_p2 = pnand %p827_p0, %p1195_p3  ;;  %s146_s28 = int_to_ptr.hbm [resolvable:$true] %s145_s28 }
  0x17   : > { %s170_s11 = sand.u32 1, %s1114_s14   ;;  %s32_s18 = sadd.s32 1, %s1122_s16 }
  0x18   : > { %830 = dma.hbm_to_vmem [thread:$0]  (!%p828_p2), %s146_s28, 128, %s148_s4, [#allocation8]  }
  0x19   : > { %833 = dma.hbm_to_vmem [thread:$0]  (!%p828_p2), %s158_s7, 128, %s160_s10, [#allocation8]  }
  0x1a   : > { %s804_s19 = sshll.u32 %s170_s11, 8  ;;  %p34_p6 = scmp.ge.s32.totalorder %s32_s18, 2 }
  0x1b   : > { %s814_s26 = sshll.u32 %s1122_s16, 8  ;;  %s174_s27 = scalar_lea.vmem [#allocation4], %s804_s19 }
  0x1c   : > { %s184_s22 = sshll.u32 %s174_s27, 4  ;;  %s1557_s18 = smov (%p34_p6, %s32_s18), 0  ;;  %s185_s22 = int_to_ptr.vmem [resolvable:$true] %s184_s22 }
  0x1d   : > { %s181_s6 = scalar_lea.hbm %s1538_s0, %s814_s26  ;;  %s36_s28 = ssub.s32 %s1122_s16, %s1557_s18 }
  0x1e   : > { %s182_s4 = sshll.u32 %s181_s6, 4  ;;  %p39_p5 = scmp.eq.s32.totalorder %s36_s28, 0  ;;  %s183_s4 = int_to_ptr.hbm [resolvable:$true] %s182_s4 }
  0x1f   : > { %s171_s9 = scalar_lea.sflag [#allocation5], %s170_s11  ;;  %s1130_s10 = smov 256  }
  0x20   : > { %s1254_s7 = scalar_select %p39_p5, %s1114_s14, %s41_s20  }
  0x21   : > { %s1131_s1 = smov 16   ;;  %196 = sbr.rel (%p1222_p12) target bundleno = 795 (0x31b), region = 32 }
  0x22   : > { %837 = dma.hbm_to_vmem [thread:$0]  (!%p1237_p4), %s183_s4, 4096, %s185_s22, %s171_s9, %s1130_s10, %s1130_s10, %s1131_s1  }
  0x23   : > { %s1261_s19 = sand.u32 (!%p1222_p12), 1, %s1110_s13  }
  0x24   : > { %s808_s26 = sshll.u32 (!%p1222_p12), %s1261_s19, 8  ;;  %s199_s27 = scalar_lea.sflag (!%p1222_p12), [#allocation5], %s1261_s19 }
  0x25   : > { %s1265_s30 = scalar_lea.vmem (!%p1222_p12), [#allocation4], %s808_s26 }
  0x26   : > { %1093 = dma.done.wait (%p1205_p7), %s199_s27, 4096  }
  0x27   : > { %1095 = vsyncadd (%p1205_p7), %s199_s27, 4294963200 }
  0x28   : > { %1097 = dma.done.wait (%p1195_p3), [#allocation8], 256  }
  0x29   : > { %1099 = vsyncadd (%p1195_p3), [#allocation8], 4294967040  ;;  %v1276_v0 = vld [vmem:[%s1265_s30 + $0xf0] sm:$0xff]  ;;  %v1279_v1 = vld [vmem:[%s1265_s30 + $0xf8] sm:$0xff]  ;;  %vm240_vm0 = vcmask 7168   ;;  %v1132_v50 = vmov 0.0   ;;  %s698_s29 = scalar_lea.hbm %s1541_s3, %s1118_s15 }
  0x2a   : > { %v1282_v2 = vld [vmem:[%s1265_s30 + $0xd0] sm:$0xff]  ;;  %v463_v3 = vadd.f32 %v1279_v1, %v1276_v0  ;;  %v1287_v4 = vld [vmem:[%s1265_s30 + $0xd8] sm:$0xff]  ;;  %v301_v9 = vld [vmem:[%s1265_s30 + $0xe0] sm:$0xff]  ;;  %v366_v49 = vmax.f32 %v1276_v0, %v1279_v1  ;;  %272 = vst.msk [vmem:[#allocation3 + $0x78] sm:$0xff] %vm240_vm0, %v1132_v50  ;;  %s1133_s1 = smov 1   ;;  %s1135_s20 = smov 127  }
  0x2b   : > { %v1290_v5 = vld [vmem:[%s1265_s30 + $0xb0] sm:$0xff]  ;;  %v1293_v6 = vld [vmem:[%s1265_s30 + $0xb8] sm:$0xff]  ;;  %v457_v7 = vadd.f32 %v1287_v4, %v1282_v2  ;;  %v302_v10 = vld [vmem:[%s1265_s30 + $0xe8] sm:$0xff]  ;;  %257 = vst.msk [vmem:[#allocation3] sm:$0xff] %vm240_vm0, %v1132_v50  ;;  %v360_v51 = vmax.f32 %v1282_v2, %v1287_v4  ;;  %s234_s8 = scalar_lea.vmem [#allocation10], %s1261_s19  ;;  %s702_s22 = sshll.u32 %s698_s29, 4  ;;  %s703_s22 = int_to_ptr.hbm [resolvable:$true] %s702_s22 }
  0x2c   : > { %v451_v8 = vadd.f32 %v1293_v6, %v1290_v5  ;;  %464 = vadd.xlane.f32.xlu0 %v463_v3  ;;  %v1302_v11 = vld [vmem:[%s1265_s30 + $0xc0] sm:$0xff]  ;;  %v1305_v12 = vld [vmem:[%s1265_s30 + $0xc8] sm:$0xff]  ;;  %v460_v15 = vadd.f32 %v302_v10, %v301_v9  ;;  %v1318_v18 = vld [vmem:[%s1265_s30 + $0x90] sm:$0xff]  ;;  %v363_v48 = vmax.f32 %v301_v9, %v302_v10  ;;  %258 = vst.msk [vmem:[#allocation3 + $0x8] sm:$0xff] %vm240_vm0, %v1132_v50  ;;  %s700_s11 = sshll.u32 %s234_s8, 4  ;;  %s690_s15 = scalar_lea.sflag [#allocation6], %s1261_s19  ;;  %s701_s11 = int_to_ptr.vmem [resolvable:$true] %s700_s11 }
  0x2d   : > { %458 = vadd.xlane.f32.xlu1 %v457_v7  ;;  %v1308_v13 = vld [vmem:[%s1265_s30 + $0xa0] sm:$0xff]  ;;  %v1311_v14 = vld [vmem:[%s1265_s30 + $0xa8] sm:$0xff]  ;;  %v454_v16 = vadd.f32 %v1305_v12, %v1302_v11  ;;  %v1321_v19 = vld [vmem:[%s1265_s30 + $0x98] sm:$0xff]  ;;  %259 = vst.msk [vmem:[#allocation3 + $0x10] sm:$0xff] %vm240_vm0, %v1132_v50  ;;  %v354_v52 = vmax.f32 %v1290_v5, %v1293_v6  ;;  %v357_v53 = vmax.f32 %v1302_v11, %v1305_v12  ;;  %s1054_s5 = sshra.s32 %s703_s22, 4  ;;  %s1060_s9 = scalar_lea.hbm %s1541_s3, 2  ;;  %s1055_s5 = int_to_ptr.hbm [resolvable:$true] %s1054_s5 }
  0x2e   : > { %452 = vadd.xlane.f32.xlu2 %v451_v8  ;;  %v448_v17 = vadd.f32 %v1311_v14, %v1308_v13  ;;  %v1324_v20 = vld [vmem:[%s1265_s30 + $0x80] sm:$0xff]  ;;  %v1327_v21 = vld [vmem:[%s1265_s30 + $0x88] sm:$0xff]  ;;  %v1330_v22 = vld [vmem:[%s1265_s30 + $0x70] sm:$0xff]  ;;  %v445_v24 = vadd.f32 %v1321_v19, %v1318_v18  ;;  %260 = vst.msk [vmem:[#allocation3 + $0x18] sm:$0xff] %vm240_vm0, %v1132_v50  ;;  %v351_v54 = vmax.f32 %v1308_v13, %v1311_v14  ;;  %s1056_s6 = scalar_lea.hbm %s1055_s5, 1  ;;  %p1061_p11 = scmp.lt.s32.totalorder %s1055_s5, %s1541_s3 }
  0x2f   : > { %v1333_v23 = vld [vmem:[%s1265_s30 + $0x78] sm:$0xff]  ;;  %v442_v25 = vadd.f32 %v1327_v21, %v1324_v20  ;;  %v1342_v27 = vld [vmem:[%s1265_s30 + $0x60] sm:$0xff]  ;;  %v1345_v28 = vld [vmem:[%s1265_s30 + $0x68] sm:$0xff]  ;;  %261 = vst.msk [vmem:[#allocation3 + $0x20] sm:$0xff] %vm240_vm0, %v1132_v50  ;;  %v348_v55 = vmax.f32 %v1318_v18, %v1321_v19  ;;  %v345_v56 = vmax.f32 %v1324_v20, %v1327_v21  ;;  %p1057_p3 = scmp.ne.s32.totalorder %s1055_s5, %s1056_s6  ;;  %p1062_p12 = scmp.lt.s32.totalorder %s1060_s9, %s1056_s6 }
  0x30   : > { %v439_v26 = vadd.f32 %v1333_v23, %v1330_v22  ;;  %v281_v29 = vld [vmem:[%s1265_s30 + $0x40] sm:$0xff]  ;;  %v282_v30 = vld [vmem:[%s1265_s30 + $0x48] sm:$0xff]  ;;  %v1350_v31 = vld [vmem:[%s1265_s30 + $0x50] sm:$0xff]  ;;  %v436_v33 = vadd.f32 %v1345_v28, %v1342_v27  ;;  %262 = vst.msk [vmem:[#allocation3 + $0x28] sm:$0xff] %vm240_vm0, %v1132_v50  ;;  %v342_v58 = vmax.f32 %v1330_v22, %v1333_v23  ;;  %v339_v59 = vmax.f32 %v1342_v27, %v1345_v28 }
  0x31   : > { %v1353_v32 = vld [vmem:[%s1265_s30 + $0x58] sm:$0xff]  ;;  %v430_v34 = vadd.f32 %v282_v30, %v281_v29  ;;  %v279_v36 = vld [vmem:[%s1265_s30 + $0x30] sm:$0xff]  ;;  %v1368_v40 = vld [vmem:[%s1265_s30 + $0x20] sm:$0xff]  ;;  %263 = vst.msk [vmem:[#allocation3 + $0x30] sm:$0xff] %vm240_vm0, %v1132_v50  ;;  %v333_v57 = vmax.f32 %v281_v29, %v282_v30  ;;  %p1058_p7 = pnand %p1057_p3, %p1209_p8  ;;  %p1063_p0 = por %p1062_p12, %p1061_p11 }
  0x32   : > { %v433_v35 = vadd.f32 %v1353_v32, %v1350_v31  ;;  %v280_v37 = vld [vmem:[%s1265_s30 + $0x38] sm:$0xff]  ;;  %v1362_v38 = vld [vmem:[%s1265_s30 + $0x10] sm:$0xff]  ;;  %v1371_v41 = vld [vmem:[%s1265_s30 + $0x28] sm:$0xff]  ;;  %264 = vst.msk [vmem:[#allocation3 + $0x38] sm:$0xff] %vm240_vm0, %v1132_v50  ;;  %v336_v60 = vmax.f32 %v1350_v31, %v1353_v32 }
  0x33   : > { %v1365_v39 = vld [vmem:[%s1265_s30 + $0x18] sm:$0xff]  ;;  %v427_v42 = vadd.f32 %v280_v37, %v279_v36  ;;  %v424_v44 = vadd.f32 %v1371_v41, %v1368_v40  ;;  %v1378_v45 = vld [vmem:[%s1265_s30] sm:$0xff]  ;;  %v1381_v46 = vld [vmem:[%s1265_s30 + $0x8] sm:$0xff]  ;;  %265 = vst.msk [vmem:[#allocation3 + $0x40] sm:$0xff] %vm240_vm0, %v1132_v50  ;;  %v330_v61 = vmax.f32 %v279_v36, %v280_v37  ;;  %p1059_p10 = pneg %p1058_p7 }
  0x34   : > { %461 = vadd.xlane.f32.xlu0 %v460_v15  ;;  %v421_v43 = vadd.f32 %v1365_v39, %v1362_v38  ;;  %v418_v47 = vadd.f32 %v1381_v46, %v1378_v45  ;;  %266 = vst.msk [vmem:[#allocation3 + $0x48] sm:$0xff] %vm240_vm0, %v1132_v50  ;;  %v417_v62 = vld [vmem:[#allocation3 + $0x78] sm:$0xff] }
  0x35   : > { %455 = vadd.xlane.f32.xlu1 %v454_v16  ;;  %267 = vst.msk [vmem:[#allocation3 + $0x50] sm:$0xff] %vm240_vm0, %v1132_v50  ;;  %p1064_p1 = pnand %p1063_p0, %p1059_p10 }
  0x36   : > { %449 = vadd.xlane.f32.xlu2 %v448_v17  ;;  %268 = vst.msk [vmem:[#allocation3 + $0x58] sm:$0xff] %vm240_vm0, %v1132_v50 }
  0x37   : > { %269 = vst.msk [vmem:[#allocation3 + $0x60] sm:$0xff] %vm240_vm0, %v1132_v50 }
  0x38   : > { %270 = vst.msk [vmem:[#allocation3 + $0x68] sm:$0xff] %vm240_vm0, %v1132_v50 }
  0x39   : > { %271 = vst.msk [vmem:[#allocation3 + $0x70] sm:$0xff] %vm240_vm0, %v1132_v50  ;;  %v409_v19 = vld [vmem:[#allocation3 + $0x38] sm:$0xff] }
  0x3a   : > { %v410_v18 = vld [vmem:[#allocation3 + $0x40] sm:$0xff] }
  0x3b   : > { %v411_v16 = vld [vmem:[#allocation3 + $0x48] sm:$0xff] }
  0x3c   : > { %446 = vadd.xlane.f32.xlu0 %v445_v24  ;;  %v412_v9 = vld [vmem:[#allocation3 + $0x50] sm:$0xff] }
  0x3d   : > { %443 = vadd.xlane.f32.xlu1 %v442_v25  ;;  %v413_v0 = vld [vmem:[#allocation3 + $0x58] sm:$0xff] }
  0x3e   : > { %440 = vadd.xlane.f32.xlu2 %v439_v26  ;;  %v414_v8 = vld [vmem:[#allocation3 + $0x60] sm:$0xff] }
  0x3f   : > { %v415_v63 = vld [vmem:[#allocation3 + $0x68] sm:$0xff] }
  0x40   : > { %v416_v7 = vld [vmem:[#allocation3 + $0x70] sm:$0xff] }
  0x44   : > { %437 = vadd.xlane.f32.xlu0 %v436_v33 }
  0x45   : > { %434 = vadd.xlane.f32.xlu1 %v433_v35  ;;  %v408_v35 = vld [vmem:[#allocation3 + $0x30] sm:$0xff] }
  0x46   : > { %431 = vadd.xlane.f32.xlu2 %v430_v34 }
  0x4c   : > { %428 = vadd.xlane.f32.xlu0 %v427_v42 }
  0x4d   : > { %425 = vadd.xlane.f32.xlu1 %v424_v44 }
  0x4e   : > { %422 = vadd.xlane.f32.xlu2 %v421_v43 }
  0x54   : > { %419 = vadd.xlane.f32.xlu0 %v418_v47 }
  0x55   : > { %367 = vmax.xlane.f32.xlu1 %v366_v49 }
  0x56   : > { %364 = vmax.xlane.f32.xlu2 %v363_v48 }
  0x5c   : > { %361 = vmax.xlane.f32.xlu0 %v360_v51 }
  0x5d   : > { %358 = vmax.xlane.f32.xlu1 %v357_v53 }
  0x5e   : > { %355 = vmax.xlane.f32.xlu2 %v354_v52 }
  0x64   : > { %352 = vmax.xlane.f32.xlu0 %v351_v54 }
  0x66   : > { %349 = vmax.xlane.f32.xlu2 %v348_v55 }
  0x6c   : > { %346 = vmax.xlane.f32.xlu0 %v345_v56  ;;  %v406_v56 = vld [vmem:[#allocation3 + $0x20] sm:$0xff] }
  0x6e   : > { %334 = vmax.xlane.f32.xlu2 %v333_v57 }
  0x74   : > { %343 = vmax.xlane.f32.xlu0 %v342_v58  ;;  %v407_v58 = vld [vmem:[#allocation3 + $0x28] sm:$0xff] }
  0x7c   : > { %340 = vmax.xlane.f32.xlu0 %v339_v59 }
  0x84   : > { %337 = vmax.xlane.f32.xlu0 %v336_v60 }
  0x8c   : > { %331 = vmax.xlane.f32.xlu0 %v330_v61 }
  0x9f   : > { %v465_v1 = vpop.xlane.xlu0 %464 }
  0xa0   : > { %v481_v2 = vadd.f32 %v465_v1, %v417_v62  ;;  %v459_v3 = vpop.xlane.xlu1 %458 }
  0xa1   : > { %v453_v4 = vpop.xlane.xlu2 %452  ;;  %v479_v5 = vadd.f32 %v459_v3, %v415_v63  ;;  %v405_v63 = vld [vmem:[#allocation3 + $0x18] sm:$0xff] }
  0xa2   : > { %v477_v6 = vadd.f32 %v453_v4, %v413_v0  ;;  %497 = vst.msk [vmem:[#allocation3 + $0x78] sm:$0xff] %vm240_vm0, %v481_v2  ;;  %v1134_v0 = vmov -inf  }
  0xa3   : > { %495 = vst.msk [vmem:[#allocation3 + $0x68] sm:$0xff] %vm240_vm0, %v479_v5  ;;  %v403_v5 = vld [vmem:[#allocation3 + $0x8] sm:$0xff] }
  0xa4   : > { %493 = vst.msk [vmem:[#allocation3 + $0x58] sm:$0xff] %vm240_vm0, %v477_v6 }
  0xa5   : > { %255 = vst.msk [vmem:[#allocation2 + $0x70] sm:$0xff] %vm240_vm0, %v1134_v0 }
  0xa6   : > { %241 = vst.msk [vmem:[#allocation2] sm:$0xff] %vm240_vm0, %v1134_v0 }
  0xa7   : > { %v462_v10 = vpop.xlane.xlu0 %461  ;;  %242 = vst.msk [vmem:[#allocation2 + $0x8] sm:$0xff] %vm240_vm0, %v1134_v0 }
  0xa8   : > { %v480_v11 = vadd.f32 %v462_v10, %v416_v7  ;;  %v456_v12 = vpop.xlane.xlu1 %455  ;;  %243 = vst.msk [vmem:[#allocation2 + $0x10] sm:$0xff] %vm240_vm0, %v1134_v0 }
  0xa9   : > { %v450_v13 = vpop.xlane.xlu2 %449  ;;  %v478_v14 = vadd.f32 %v456_v12, %v414_v8  ;;  %v532_v21 = vld [vmem:[#allocation3 + $0x78] sm:$0xff]  ;;  %244 = vst.msk [vmem:[#allocation2 + $0x18] sm:$0xff] %vm240_vm0, %v1134_v0  ;;  %v402_v12 = vld [vmem:[#allocation3] sm:$0xff] }
  0xaa   : > { %v476_v15 = vadd.f32 %v450_v13, %v412_v9  ;;  %496 = vst.msk [vmem:[#allocation3 + $0x70] sm:$0xff] %vm240_vm0, %v480_v11  ;;  %v530_v17 = vld [vmem:[#allocation3 + $0x68] sm:$0xff]  ;;  %v548_v30 = vmul.f32 0.00390625, %v532_v21  ;;  %v404_v11 = vld [vmem:[#allocation3 + $0x10] sm:$0xff] }
  0xab   : > { %494 = vst.msk [vmem:[#allocation3 + $0x60] sm:$0xff] %vm240_vm0, %v478_v14  ;;  %v546_v26 = vmul.f32 0.00390625, %v530_v17  ;;  %v528_v37 = vld [vmem:[#allocation3 + $0x58] sm:$0xff] }
  0xac   : > { %492 = vst.msk [vmem:[#allocation3 + $0x50] sm:$0xff] %vm240_vm0, %v476_v15  ;;  %v544_v47 = vmul.f32 0.00390625, %v528_v37  ;;  %v319_v8 = vld [vmem:[#allocation2 + $0x70] sm:$0xff] }
  0xad   : > { %245 = vst.msk [vmem:[#allocation2 + $0x20] sm:$0xff] %vm240_vm0, %v1134_v0 }
  0xae   : > { %246 = vst.msk [vmem:[#allocation2 + $0x28] sm:$0xff] %vm240_vm0, %v1134_v0 }
  0xaf   : > { %v447_v20 = vpop.xlane.xlu0 %446  ;;  %247 = vst.msk [vmem:[#allocation2 + $0x30] sm:$0xff] %vm240_vm0, %v1134_v0 }
  0xb0   : > { %v475_v22 = vadd.f32 %v447_v20, %v411_v16  ;;  %v444_v23 = vpop.xlane.xlu1 %443  ;;  %248 = vst.msk [vmem:[#allocation2 + $0x38] sm:$0xff] %vm240_vm0, %v1134_v0 }
  0xb1   : > { %v441_v24 = vpop.xlane.xlu2 %440  ;;  %v531_v25 = vld [vmem:[#allocation3 + $0x70] sm:$0xff]  ;;  %v474_v27 = vadd.f32 %v444_v23, %v410_v18  ;;  %249 = vst.msk [vmem:[#allocation2 + $0x40] sm:$0xff] %vm240_vm0, %v1134_v0  ;;  %v321_v23 = vmax.f32 %v1378_v45, %v1381_v46 }
  0xb2   : > { %v473_v28 = vadd.f32 %v441_v24, %v409_v19  ;;  %491 = vst.msk [vmem:[#allocation3 + $0x48] sm:$0xff] %vm240_vm0, %v475_v22  ;;  %v547_v29 = vmul.f32 0.00390625, %v531_v25  ;;  %v529_v31 = vld [vmem:[#allocation3 + $0x60] sm:$0xff] }
  0xb3   : > { %v545_v32 = vmul.f32 0.00390625, %v529_v31  ;;  %490 = vst.msk [vmem:[#allocation3 + $0x40] sm:$0xff] %vm240_vm0, %v474_v27  ;;  %v527_v36 = vld [vmem:[#allocation3 + $0x50] sm:$0xff] }
  0xb4   : > { %v905_v33 = vpack.i.bf16 %v547_v29, %v548_v30  ;;  %489 = vst.msk [vmem:[#allocation3 + $0x38] sm:$0xff] %vm240_vm0, %v473_v28  ;;  %v543_v44 = vmul.f32 0.00390625, %v527_v36  ;;  %v309_v45 = vld [vmem:[#allocation2 + $0x20] sm:$0xff] }
  0xb5   : > { %v910_v34 = vpack.i.bf16 %v545_v32, %v546_v26  ;;  %250 = vst.msk [vmem:[#allocation2 + $0x48] sm:$0xff] %vm240_vm0, %v1134_v0 }
  0xb6   : > { %906 = vrot.lane.b32.xlu1 %v905_v33, %s1133_s1  ;;  %v915_v50 = vpack.i.bf16 %v543_v44, %v544_v47  ;;  %251 = vst.msk [vmem:[#allocation2 + $0x50] sm:$0xff] %vm240_vm0, %v1134_v0  ;;  %v327_v44 = vmax.f32 %v1368_v40, %v1371_v41  ;;  %v324_v47 = vmax.f32 %v1362_v38, %v1365_v39  ;;  %v311_v39 = vld [vmem:[#allocation2 + $0x30] sm:$0xff] }
  0xb7   : > { %911 = vrot.lane.b32.xlu2 %v910_v34, %s1133_s1  ;;  %v438_v42 = vpop.xlane.xlu0 %437  ;;  %252 = vst.msk [vmem:[#allocation2 + $0x58] sm:$0xff] %vm240_vm0, %v1134_v0 }
  0xb8   : > { %v472_v43 = vadd.f32 %v438_v42, %v408_v35  ;;  %v435_v57 = vpop.xlane.xlu1 %434  ;;  %253 = vst.msk [vmem:[#allocation2 + $0x60] sm:$0xff] %vm240_vm0, %v1134_v0  ;;  %v313_v42 = vld [vmem:[#allocation2 + $0x40] sm:$0xff] }
  0xb9   : > { %v526_v49 = vld [vmem:[#allocation3 + $0x48] sm:$0xff]  ;;  %v432_v55 = vpop.xlane.xlu2 %431  ;;  %v471_v61 = vadd.f32 %v435_v57, %v407_v58  ;;  %254 = vst.msk [vmem:[#allocation2 + $0x68] sm:$0xff] %vm240_vm0, %v1134_v0 }
  0xba   : > { %488 = vst.msk [vmem:[#allocation3 + $0x30] sm:$0xff] %vm240_vm0, %v472_v43  ;;  %v525_v48 = vld [vmem:[#allocation3 + $0x40] sm:$0xff]  ;;  %v542_v53 = vmul.f32 0.00390625, %v526_v49  ;;  %v470_v60 = vadd.f32 %v432_v55, %v406_v56 }
  0xbb   : > { %v524_v51 = vld [vmem:[#allocation3 + $0x38] sm:$0xff]  ;;  %v541_v52 = vmul.f32 0.00390625, %v525_v48  ;;  %487 = vst.msk [vmem:[#allocation3 + $0x28] sm:$0xff] %vm240_vm0, %v471_v61 }
  0xbc   : > { %v540_v54 = vmul.f32 0.00390625, %v524_v51  ;;  %486 = vst.msk [vmem:[#allocation3 + $0x20] sm:$0xff] %vm240_vm0, %v470_v60  ;;  %v314_v27 = vld [vmem:[#allocation2 + $0x48] sm:$0xff] }
  0xbd   : > { %v920_v1 = vpack.i.bf16 %v541_v52, %v542_v53  ;;  %256 = vst.msk [vmem:[#allocation2 + $0x78] sm:$0xff] %vm240_vm0, %v1134_v0  ;;  %v315_v29 = vld [vmem:[#allocation2 + $0x50] sm:$0xff]  ;;  %v312_v53 = vld [vmem:[#allocation2 + $0x38] sm:$0xff] }
  0xbe   : > { %916 = vrot.lane.b32.xlu1 %v915_v50, %s1133_s1  ;;  %v316_v18 = vld [vmem:[#allocation2 + $0x58] sm:$0xff] }
  0xbf   : > { %v429_v62 = vpop.xlane.xlu0 %428  ;;  %v317_v28 = vld [vmem:[#allocation2 + $0x60] sm:$0xff] }
  0xc0   : > { %v469_v3 = vadd.f32 %v429_v62, %v405_v63  ;;  %v426_v10 = vpop.xlane.xlu1 %425  ;;  %v318_v22 = vld [vmem:[#allocation2 + $0x68] sm:$0xff] }
  0xc1   : > { %v523_v59 = vld [vmem:[#allocation3 + $0x30] sm:$0xff]  ;;  %v423_v6 = vpop.xlane.xlu2 %422  ;;  %v468_v15 = vadd.f32 %v426_v10, %v404_v11  ;;  %v310_v62 = vld [vmem:[#allocation2 + $0x28] sm:$0xff] }
  0xc2   : > { %v539_v2 = vmul.f32 0.00390625, %v523_v59  ;;  %485 = vst.msk [vmem:[#allocation3 + $0x18] sm:$0xff] %vm240_vm0, %v469_v3  ;;  %v467_v7 = vadd.f32 %v423_v6, %v403_v5  ;;  %v522_v49 = vld [vmem:[#allocation3 + $0x28] sm:$0xff]  ;;  %v308_v5 = vld [vmem:[#allocation2 + $0x18] sm:$0xff] }
  0xc3   : > { %484 = vst.msk [vmem:[#allocation3 + $0x10] sm:$0xff] %vm240_vm0, %v468_v15  ;;  %v521_v48 = vld [vmem:[#allocation3 + $0x20] sm:$0xff]  ;;  %v538_v51 = vmul.f32 0.00390625, %v522_v49 }
  0xc4   : > { %v925_v4 = vpack.i.bf16 %v539_v2, %v540_v54  ;;  %483 = vst.msk [vmem:[#allocation3 + $0x8] sm:$0xff] %vm240_vm0, %v467_v7  ;;  %v320_v24 = vld [vmem:[#allocation2 + $0x78] sm:$0xff]  ;;  %v537_v50 = vmul.f32 0.00390625, %v521_v48 }
  0xc6   : > { %921 = vrot.lane.b32.xlu1 %v920_v1, %s1133_s1  ;;  %926 = vrot.lane.b32.xlu0 %v925_v4, %s1133_s1  ;;  %v930_v55 = vpack.i.bf16 %v537_v50, %v538_v51 }
  0xc7   : > { %v420_v14 = vpop.xlane.xlu0 %419 }
  0xc8   : > { %v466_v16 = vadd.f32 %v420_v14, %v402_v12  ;;  %v368_v19 = vpop.xlane.xlu1 %367 }
  0xc9   : > { %v365_v9 = vpop.xlane.xlu2 %364  ;;  %v384_v26 = vmax.f32 %v320_v24, %v368_v19  ;;  %v520_v61 = vld [vmem:[#allocation3 + $0x18] sm:$0xff] }
  0xca   : > { %v383_v13 = vmax.f32 %v319_v8, %v365_v9  ;;  %482 = vst.msk [vmem:[#allocation3] sm:$0xff] %vm240_vm0, %v466_v16  ;;  %v519_v60 = vld [vmem:[#allocation3 + $0x10] sm:$0xff]  ;;  %v536_v0 = vmul.f32 0.00390625, %v520_v61 }
  0xcb   : > { %401 = vst.msk [vmem:[#allocation2 + $0x78] sm:$0xff] %vm240_vm0, %v384_v26  ;;  %v518_v57 = vld [vmem:[#allocation3 + $0x8] sm:$0xff]  ;;  %v535_v63 = vmul.f32 0.00390625, %v519_v60 }
  0xcc   : > { %400 = vst.msk [vmem:[#allocation2 + $0x70] sm:$0xff] %vm240_vm0, %v383_v13  ;;  %v534_v38 = vmul.f32 0.00390625, %v518_v57  ;;  %v306_v57 = vld [vmem:[#allocation2 + $0x8] sm:$0xff] }
  0xcd   : > { %v935_v3 = vpack.i.bf16 %v535_v63, %v536_v0 }
  0xcf   : > { %v362_v21 = vpop.xlane.xlu0 %361 }
  0xd0   : > { %v382_v25 = vmax.f32 %v318_v22, %v362_v21  ;;  %v359_v31 = vpop.xlane.xlu1 %358 }
  0xd1   : > { %v356_v17 = vpop.xlane.xlu2 %355  ;;  %v381_v33 = vmax.f32 %v317_v28, %v359_v31  ;;  %v517_v56 = vld [vmem:[#allocation3] sm:$0xff] }
  0xd2   : > { %v380_v20 = vmax.f32 %v316_v18, %v356_v17  ;;  %399 = vst.msk [vmem:[#allocation2 + $0x68] sm:$0xff] %vm240_vm0, %v382_v25  ;;  %v533_v40 = vmul.f32 0.00390625, %v517_v56  ;;  %v516_v11 = vld [vmem:[#allocation2 + $0x78] sm:$0xff]  ;;  %v307_v56 = vld [vmem:[#allocation2 + $0x10] sm:$0xff] }
  0xd3   : > { %398 = vst.msk [vmem:[#allocation2 + $0x60] sm:$0xff] %vm240_vm0, %v381_v33  ;;  %v515_v14 = vld [vmem:[#allocation2 + $0x70] sm:$0xff] }
  0xd4   : > { %397 = vst.msk [vmem:[#allocation2 + $0x58] sm:$0xff] %vm240_vm0, %v380_v20  ;;  %v940_v59 = vpack.i.bf16 %v533_v40, %v534_v38 }
  0xd7   : > { %v353_v34 = vpop.xlane.xlu0 %352 }
  0xd8   : > { %v379_v35 = vmax.f32 %v315_v29, %v353_v34 }
  0xd9   : > { %v350_v30 = vpop.xlane.xlu2 %349  ;;  %v514_v15 = vld [vmem:[#allocation2 + $0x68] sm:$0xff] }
  0xda   : > { %v378_v32 = vmax.f32 %v314_v27, %v350_v30  ;;  %396 = vst.msk [vmem:[#allocation2 + $0x50] sm:$0xff] %vm240_vm0, %v379_v35  ;;  %v513_v18 = vld [vmem:[#allocation2 + $0x60] sm:$0xff] }
  0xdb   : > { %v512_v24 = vld [vmem:[#allocation2 + $0x58] sm:$0xff] }
  0xdc   : > { %395 = vst.msk [vmem:[#allocation2 + $0x48] sm:$0xff] %vm240_vm0, %v378_v32 }
  0xdf   : > { %v347_v37 = vpop.xlane.xlu0 %346 }
  0xe0   : > { %322 = vmax.xlane.f32.xlu2 %v321_v23  ;;  %v377_v43 = vmax.f32 %v313_v42, %v347_v37 }
  0xe1   : > { %v335_v46 = vpop.xlane.xlu2 %334  ;;  %v511_v26 = vld [vmem:[#allocation2 + $0x50] sm:$0xff] }
  0xe2   : > { %v373_v36 = vmax.f32 %v309_v45, %v335_v46  ;;  %394 = vst.msk [vmem:[#allocation2 + $0x40] sm:$0xff] %vm240_vm0, %v377_v43 }
  0xe3   : > { %v510_v32 = vld [vmem:[#allocation2 + $0x48] sm:$0xff] }
  0xe4   : > { %390 = vst.msk [vmem:[#allocation2 + $0x20] sm:$0xff] %vm240_vm0, %v373_v36 }
  0xe7   : > { %v344_v52 = vpop.xlane.xlu0 %343 }
  0xe8   : > { %v376_v54 = vmax.f32 %v312_v53, %v344_v52 }
  0xe9   : > { %v509_v35 = vld [vmem:[#allocation2 + $0x40] sm:$0xff] }
  0xea   : > { %393 = vst.msk [vmem:[#allocation2 + $0x38] sm:$0xff] %vm240_vm0, %v376_v54 }
  0xeb   : > { %v505_v54 = vld [vmem:[#allocation2 + $0x20] sm:$0xff] }
  0xef   : > { %v341_v41 = vpop.xlane.xlu0 %340 }
  0xf0   : > { %328 = vmax.xlane.f32.xlu1 %v327_v44  ;;  %325 = vmax.xlane.f32.xlu0 %v324_v47  ;;  %v375_v58 = vmax.f32 %v311_v39, %v341_v41  ;;  %v305_v44 = vld [vmem:[#allocation2] sm:$0xff] }
  0xf1   : > { %v508_v36 = vld [vmem:[#allocation2 + $0x38] sm:$0xff] }
  0xf2   : > { %392 = vst.msk [vmem:[#allocation2 + $0x30] sm:$0xff] %vm240_vm0, %v375_v58 }
  0xf7   : > { %v338_v1 = vpop.xlane.xlu0 %337 }
  0xf8   : > { %931 = vrot.lane.b32.xlu2 %v930_v55, %s1133_s1  ;;  %v374_v2 = vmax.f32 %v310_v62, %v338_v1 }
  0xf9   : > { %v507_v42 = vld [vmem:[#allocation2 + $0x30] sm:$0xff] }
  0xfa   : > { %391 = vst.msk [vmem:[#allocation2 + $0x28] sm:$0xff] %vm240_vm0, %v374_v2 }
  0xff   : > { %v332_v4 = vpop.xlane.xlu0 %331 }
 0x100   : > { %941 = vrot.lane.b32.xlu2 %v940_v59, %s1133_s1  ;;  %v372_v6 = vmax.f32 %v308_v5, %v332_v4 }
 0x101   : > { %v506_v52 = vld [vmem:[#allocation2 + $0x28] sm:$0xff] }
 0x102   : > { %389 = vst.msk [vmem:[#allocation2 + $0x18] sm:$0xff] %vm240_vm0, %v372_v6 }
 0x109   : > { %936 = vrot.lane.b32.xlu1 %v935_v3, %s1133_s1  ;;  %v504_v62 = vld [vmem:[#allocation2 + $0x18] sm:$0xff] }
 0x111   : > { %v912_v7 = vpop.permute.xlu2 %911 }
 0x112   : > { %v913_v12 = vunpack.i.l.bf16 %v912_v7  ;;  %v914_v16 = vunpack.i.h.bf16 %v912_v7  ;;  %v629_v7 = vld [vmem:[#allocation7] sm:$0xff] }
 0x114   : > { %v626_v19 = vsel %vm240_vm0, %v514_v15, %v913_v12  ;;  %v625_v23 = vsel %vm240_vm0, %v513_v18, %v914_v16 }
 0x128   : > { %v907_v8 = vpop.permute.xlu1 %906 }
 0x129   : > { %v909_v9 = vunpack.i.h.bf16 %v907_v8  ;;  %v908_v10 = vunpack.i.l.bf16 %v907_v8 }
 0x12b   : > { %v628_v13 = vsel %vm240_vm0, %v516_v11, %v908_v10  ;;  %v627_v17 = vsel %vm240_vm0, %v515_v14, %v909_v9  ;;  %v1136_v11 = vmov 0   ;;  %v630_v14 = vld [vmem:[#allocation9] sm:$0xff] }
 0x12c   : > { %631 = vmatpush.msra.mxu0 %v628_v13  ;;  %945 = vset.pattern.permute.xlu0 %v1136_v11 }
 0x12e   : > { %632 = vmatpush.msra.mxu0 %v627_v17 }
 0x130   : > { %v917_v20 = vpop.permute.xlu1 %916  ;;  %633 = vmatpush.msra.mxu0 %v626_v19 }
 0x131   : > { %v919_v21 = vunpack.i.h.bf16 %v917_v20  ;;  %v918_v22 = vunpack.i.l.bf16 %v917_v20 }
 0x132   : > { %634 = vmatpush.msra.mxu0 %v625_v23 }
 0x133   : > { %v624_v25 = vsel %vm240_vm0, %v512_v24, %v918_v22  ;;  %v623_v27 = vsel %vm240_vm0, %v511_v26, %v919_v21 }
 0x134   : > { %635 = vmatpush.msra.mxu0 %v624_v25 }
 0x136   : > { %636 = vmatpush.msra.mxu0 %v623_v27 }
 0x138   : > { %v922_v28 = vpop.permute.xlu1 %921  ;;  %v927_v29 = vpop.permute.xlu0 %926 }
 0x139   : > { %v924_v30 = vunpack.i.h.bf16 %v922_v28  ;;  %v923_v31 = vunpack.i.l.bf16 %v922_v28  ;;  %v928_v33 = vunpack.i.l.bf16 %v927_v29  ;;  %v929_v45 = vunpack.i.h.bf16 %v927_v29 }
 0x13b   : > { %v622_v34 = vsel %vm240_vm0, %v510_v32, %v923_v31  ;;  %v621_v46 = vsel %vm240_vm0, %v509_v35, %v924_v30  ;;  %v620_v37 = vsel %vm240_vm0, %v508_v36, %v928_v33  ;;  %v619_v43 = vsel %vm240_vm0, %v507_v42, %v929_v45 }
 0x13c   : > { %637 = vmatpush.msra.mxu0 %v622_v34 }
 0x13e   : > { %638 = vmatpush.msra.mxu0 %v621_v46 }
 0x140   : > { %639 = vmatpush.msra.mxu0 %v620_v37 }
 0x142   : > { %640 = vmatpush.msra.mxu0 %v619_v43 }
 0x153   : > { %v323_v47 = vpop.xlane.xlu2 %322 }
 0x154   : > { %v369_v48 = vmax.f32 %v305_v44, %v323_v47 }
 0x156   : > { %386 = vst.msk [vmem:[#allocation2] sm:$0xff] %vm240_vm0, %v369_v48 }
 0x15b   : > { %v932_v49 = vpop.permute.xlu2 %931 }
 0x15c   : > { %v934_v50 = vunpack.i.h.bf16 %v932_v49  ;;  %v933_v51 = vunpack.i.l.bf16 %v932_v49 }
 0x15d   : > { %v501_v5 = vld [vmem:[#allocation2] sm:$0xff] }
 0x15e   : > { %v618_v53 = vsel %vm240_vm0, %v506_v52, %v933_v51  ;;  %v617_v55 = vsel %vm240_vm0, %v505_v54, %v934_v50 }
 0x15f   : > { %641 = vmatpush.msra.mxu0 %v618_v53 }
 0x161   : > { %642 = vmatpush.msra.mxu0 %v617_v55 }
 0x163   : > { %v329_v40 = vpop.xlane.xlu1 %328  ;;  %v326_v38 = vpop.xlane.xlu0 %325 }
 0x164   : > { %v371_v39 = vmax.f32 %v307_v56, %v329_v40  ;;  %v370_v41 = vmax.f32 %v306_v57, %v326_v38  ;;  %v942_v58 = vpop.permute.xlu2 %941 }
 0x165   : > { %v943_v63 = vunpack.i.l.bf16 %v942_v58  ;;  %v944_v3 = vunpack.i.h.bf16 %v942_v58 }
 0x166   : > { %388 = vst.msk [vmem:[#allocation2 + $0x10] sm:$0xff] %vm240_vm0, %v371_v39 }
 0x167   : > { %387 = vst.msk [vmem:[#allocation2 + $0x8] sm:$0xff] %vm240_vm0, %v370_v41  ;;  %v613_v8 = vsel %vm240_vm0, %v501_v5, %v944_v3 }
 0x16d   : > { %v503_v1 = vld [vmem:[#allocation2 + $0x10] sm:$0xff] }
 0x16e   : > { %v502_v2 = vld [vmem:[#allocation2 + $0x8] sm:$0xff] }
 0x16f   : > { %v614_v6 = vsel %vm240_vm0, %v502_v2, %v943_v63 }
 0x17b   : > { %v937_v59 = vpop.permute.xlu1 %936 }
 0x17c   : > { %v939_v60 = vunpack.i.h.bf16 %v937_v59  ;;  %v938_v61 = vunpack.i.l.bf16 %v937_v59 }
 0x17e   : > { %v616_v0 = vsel %vm240_vm0, %v504_v62, %v938_v61  ;;  %v615_v4 = vsel %vm240_vm0, %v503_v1, %v939_v60 }
 0x17f   : > { %643 = vmatpush.msra.mxu0 %v616_v0 }
 0x181   : > { %644 = vmatpush.msra.mxu0 %v615_v4 }
 0x183   : > { %645 = vmatpush.msra.mxu0 %v614_v6 }
 0x185   : > { %646 = vmatpush.msra.mxu0 %v613_v8 }
 0x186   : > { %647 = vmatmul.f32.vlgmr.msra.gmra.mxu0 %v629_v7 }
 0x203   : > { %v648_v9 = vpop.f32.mrf.mxu0 }
 0x204   : > { %v651_v10 = vmax.f32 %v648_v9, 0.0 }
 0x206   : > { %653 = vrot.lane.b32.xlu1 %v651_v10, %s1135_s20 }
 0x278   : > { %v654_v12 = vpop.permute.xlu1 %653 }
 0x279   : > { %v656_v13 = vadd.f32 %v654_v12, %v651_v10 }
 0x27b   : > { %659 = vperm.xlu0 %945, %v656_v13  }
 0x2ed   : > { %v660_v15 = vpop.permute.xlu0 %659 }
 0x2ee   : > { %v662_v16 = vmul.f32 %v660_v15, %v630_v14 }
 0x2f0   : > { %v663_v17 = vrot.slane %v662_v16, 4 }
 0x2f2   : > { %v664_v18 = vadd.f32 %v663_v17, %v662_v16 }
 0x2f4   : > { %v665_v19 = vrot.slane %v664_v18, 2 }
 0x2f6   : > { %v666_v20 = vadd.f32 %v665_v19, %v664_v18 }
 0x2f8   : > { %v667_v21 = vrot.slane %v666_v20, 1 }
 0x2fa   : > { %v668_v22 = vadd.f32 %v667_v21, %v666_v20 }
 0x2fc   : > { %v811_v23 = vmul.f32 -1.442695, %v668_v22 }
 0x2fe   : > { %946 = vpow2.f32 %v811_v23 }
 0x304   : > { %v947_v24 = vpop.eup %946 }
 0x305   : > { %v672_v25 = vadd.f32 1.0, %v947_v24 }
 0x307   : > { %948 = vrcp.f32 %v672_v25  ;;  %v684_v29 = vand.u32 2147483648, %v672_v25  ;;  %v682_v31 = vand.u32 2147483647, %v672_v25  ;;  %vm678_vm2 = vweird.f32 %v672_v25 }
 0x309   : > { %v685_v33 = vor.u32 1.1754944e-38, %v684_v29  ;;  %vm683_vm4 = vcmp.eq.f32.partialorder %v682_v31, 8.507059e+37 }
 0x30d   : > { %v949_v26 = vpop.eup %948 }
 0x30e   : > { %v674_v27 = vmul.f32 %v949_v26, %v672_v25  ;;  %vm679_vm1 = vweird.f32 %v949_v26 }
 0x30f   : > { %vm680_vm3 = vmor %vm678_vm2, %vm679_vm1 }
 0x310   : > { %v675_v28 = vsub.f32 1.0, %v674_v27 }
 0x312   : > { %v676_v30 = vmul.f32 %v949_v26, %v675_v28 }
 0x314   : > { %v677_v32 = vadd.f32 %v949_v26, %v676_v30 }
 0x316   : > { %v681_v34 = vsel %vm680_vm3, %v949_v26, %v677_v32 }
 0x317   : > { %v686_v35 = vsel %vm683_vm4, %v685_v33, %v681_v34 }
 0x318   : > { %688 = vst [vmem:[%s234_s8] sm:$0x1] %v686_v35 }
 0x319   : > { %1067 = shalt.err (!%p1064_p1)
}
 0x31a   : > { %825 = dma.vmem_to_hbm [thread:$0]  (%p1209_p8), %s701_s11, 16, %s703_s22, %s690_s15  }
 0x31b PF: > { %s714_s19 = sand.u32 1, %s1106_s12   ;;  %p839_p2 = pnand %p803_p13, %p1213_p9 }
 0x31c   : > { %s715_s27 = scalar_lea.sflag [#allocation6], %s714_s19 }
 0x31d   : > { %p840_p4 = pneg %p839_p2 }
 0x31f   : > { %1101 = dma.done.wait (%p840_p4), %s715_s27, 16  }
 0x320   : > { %1103 = vsyncadd (%p840_p4), %s715_s27, 4294967280  ;;  %s20_s17 = sadd.s32 1, %s1126_s17   ;;  %s1551_s12 = smov %s1110_s13 }
 0x321   : > { %p17_p6 = scmp.ge.s32.totalorder %s20_s17, 4   ;;  %s1552_s13 = smov %s1114_s14 }
 0x322   : > { %s1553_s14 = smov %s1254_s7  ;;  %s1554_s15 = smov %s1122_s16 }
 0x323   : > { %s1555_s16 = smov %s1557_s18  ;;  %19 = sbr.rel (!%p17_p6) target bundleno = 9 (0x9), region = 93 }
 0x328   :  { %720 = vsyncpa [#allocation5], 1 }
 0x329   :  { %722 = vsyncpa [#allocation5 + $0x1], 1 }
 0x32a   :  { %723 = vsyncpa [#allocation8], 1 }
 0x32b   :  { %724 = vsyncpa [#allocation6], 1 }
 0x32c   :  { %726 = vsyncpa [#allocation6 + $0x1], 1 }

</bundles_post_ra>
